<compile_context>
chip_gen: v7x
topology: tpu7x:2x2x1
jax: 0.10.0
libtpu: 0.0.40
codegen_flags: <defaults>
</compile_context>

<pallas_src>
import jax
import jax.numpy as jnp
from jax.experimental import pallas as pl
from jax.experimental.pallas import tpu as pltpu


def _cdiv(a, b):
    return -(-a // b)


def _round_up(a, m):
    return _cdiv(a, m) * m


def _attention_kernel_fused(x_ref, w_ref, ctx_ref, aw_ref):
    """One batch-block, single softmax.

    x_ref  : (TB, S, H) VMEM  -- lstm_output tile
    w_ref  : (1, H)     VMEM  -- nn.Linear(hidden, 1) weight
    ctx_ref: (TB, 1, H) VMEM  -- context vectors (wrapper squeezes the middle dim)
    aw_ref : (TB, S)    VMEM  -- attention weights, lane-dense (S on the lane axis)
    """
    x = x_ref[...]
    w = w_ref[...].astype(x.dtype)                       # (1, H)

    # Linear(hidden -> 1): scores[b, s] = sum_h x[b, s, h] * w[h]
    # (bias dropped: constant along the softmax axis cancels exactly).
    # Big multiply stays in the input dtype (bf16-friendly on v6e/v7x); the reduction
    # accumulates in f32.  Single consumer -> no long-lived (TB, S, H) temp.
    scores = jnp.sum((x * w).astype(jnp.float32), axis=-1)          # (TB, S)

    # Softmax over the sequence axis, computed once, lane-dense.
    m = jnp.max(scores, axis=-1, keepdims=True)                     # (TB, 1)
    e = jnp.exp(scores - m)                                         # (TB, S)
    d = jnp.sum(e, axis=-1, keepdims=True)                          # (TB, 1)
    inv = pl.reciprocal(d, approx=True)                             # EUP slot
    inv = inv * (2.0 - d * inv)                                     # Newton step -> ~f32 exact
    weights = e * inv                                               # (TB, S) f32

    aw_ref[...] = weights.astype(aw_ref.dtype)                      # dense, unmasked stores

    # context[b, h] = sum_s weights[b, s] * x[b, s, h]
    # Only the small (TB, S) weights get relaid out (lane -> sublane); x is consumed
    # in place.  keepdims sublane-reduce -> (TB, 1, H); the (tb, 1, H) output block is
    # kept 3-D to avoid a second in-kernel cross-sublane relayout (the ctx array is
    # S-times smaller than x, so the 1/8 sublane packing of its stores is negligible).
    w_b = weights.astype(x.dtype)[:, :, None]                       # (TB, S, 1)
    ctx = jnp.sum((w_b * x).astype(jnp.float32), axis=1, keepdims=True)
    ctx_ref[...] = ctx.astype(ctx_ref.dtype)


def _attention_kernel_fallback(x_ref, w_ref, ctx_ref, aw_ref):
    """Known-good dual-layout variant (previously validated on TPU).

    Recomputes the cheap softmax in a second layout instead of relaying out the
    weights; only used if this jaxlib's Mosaic rejects the fused kernel's small
    (TB, S) -> (TB, S, 1) relayout.
    """
    x = x_ref[...]
    xf = x.astype(jnp.float32)
    w = w_ref[...].astype(jnp.float32)                   # (1, H)
    prod = xf * w                                        # (TB, S, H)

    # Path 1: S on sublanes -> feeds the context reduction directly.
    s3 = jnp.sum(prod, axis=-1, keepdims=True)           # (TB, S, 1)
    m3 = jnp.max(s3, axis=1, keepdims=True)
    e3 = jnp.exp(s3 - m3)
    d3 = jnp.sum(e3, axis=1, keepdims=True)
    inv3 = pl.reciprocal(d3, approx=True)
    inv3 = inv3 * (2.0 - d3 * inv3)
    ctx = jnp.sum((e3 * inv3) * xf, axis=1, keepdims=True)           # (TB, 1, H)
    ctx_ref[...] = ctx.astype(ctx_ref.dtype)

    # Path 2: S on lanes -> dense attention-weights store.
    s2 = jnp.sum(prod, axis=-1)                          # (TB, S)
    m2 = jnp.max(s2, axis=-1, keepdims=True)
    e2 = jnp.exp(s2 - m2)
    d2 = jnp.sum(e2, axis=-1, keepdims=True)
    inv2 = pl.reciprocal(d2, approx=True)
    inv2 = inv2 * (2.0 - d2 * inv2)
    aw_ref[...] = (e2 * inv2).astype(aw_ref.dtype)


def _vmem_capacity_bytes():
    """Per-core VMEM capacity (128 MiB on v5e/v6e, 64 MiB on v7x); conservative default."""
    try:
        info = pltpu.get_tpu_info()
        for attr in ("vmem_capacity_bytes", "vmem_size_bytes", "vmem_bytes"):
            v = getattr(info, attr, None)
            if v:
                return int(v)
    except Exception:
        pass
    return 64 * 1024 * 1024


def _choose_block_batch(S, H, itemsize, vmem_bytes):
    """Largest batch rows per block such that the per-step working set fits comfortably.

    Per batch row we count:
      * 2x the input tile (double-buffered BlockSpec pipeline)  : 2 * S*H*itemsize
      * ~2 f32-sized vector intermediates the compiler may spill: 2 * S*H*4
      * outputs + softmax statistics (small)
    """
    per_row = S * H * (2 * itemsize + 8) + (S + H) * 8 + 1024
    budget = int(vmem_bytes * 0.6)          # headroom for compiler scratch / semaphores
    tb = budget // max(per_row, 1)
    tb = max(8, min(tb, 1024))
    tb = (tb // 8) * 8
    return tb, per_row


def attention_forward(lstm_output, weight, bias=None):
    """lstm_output: (B, S, H), weight: (1, H), bias: (1,) (unused: cancels in softmax).

    Returns (context (B, H), attention_weights (B, S, 1))."""
    del bias  # softmax(Wx + b, dim=1) == softmax(Wx, dim=1): bias is a mathematical no-op.

    B, S, H = lstm_output.shape
    dtype = lstm_output.dtype
    itemsize = jnp.dtype(dtype).itemsize

    vmem_cap = _vmem_capacity_bytes()
    tb, per_row = _choose_block_batch(S, H, itemsize, vmem_cap)

    if B <= tb:
        if B >= 16:
            # Keep >= 2 grid blocks so ("parallel",) can shard across v7x's 2 TensorCores.
            tb = _round_up(_cdiv(B, 2), 8)
        else:
            tb = B            # single block: block dims == array dims (always legal)
    num_blocks = _cdiv(B, tb)
    if num_blocks > 1:
        # Rebalance so the last block is not mostly zero-padded rows.
        tb = _round_up(_cdiv(B, num_blocks), 8)
        num_blocks = _cdiv(B, tb)
    b_pad = num_blocks * tb

    x = lstm_output
    if b_pad != B:
        # Zero padding is benign: padded rows produce a uniform softmax, sliced off below.
        x = jnp.pad(x, ((0, b_pad - B), (0, 0), (0, 0)))

    est_bytes = tb * per_row + (1 << 20)
    vmem_limit = int(min(vmem_cap, max(2 * est_bytes, 32 * 1024 * 1024)))

    def run(kernel):
        return pl.pallas_call(
            kernel,
            out_shape=(
                jax.ShapeDtypeStruct((b_pad, 1, H), dtype),
                jax.ShapeDtypeStruct((b_pad, S), dtype),
            ),
            grid_spec=pltpu.PrefetchScalarGridSpec(
                num_scalar_prefetch=0,
                grid=(num_blocks,),
                in_specs=[
                    pl.BlockSpec((tb, S, H), lambda i: (i, 0, 0)),
                    pl.BlockSpec((1, H), lambda i: (0, 0)),
                ],
                out_specs=[
                    pl.BlockSpec((tb, 1, H), lambda i: (i, 0, 0)),
                    pl.BlockSpec((tb, S), lambda i: (i, 0)),
                ],
            ),
            compiler_params=pltpu.CompilerParams(
                dimension_semantics=("parallel",),   # batch blocks are independent
                vmem_limit_bytes=vmem_limit,
            ),
        )(x, weight)

    try:
        ctx3, aw = run(_attention_kernel_fused)
    except Exception:
        # Some Mosaic versions may reject the fused kernel's tiny lane->sublane
        # relayout of the weights; fall back to the validated dual-layout kernel.
        ctx3, aw = run(_attention_kernel_fallback)

    context = ctx3[:B, 0, :]
    attention_weights = aw[:B, :, None]              # back to the PyTorch (B, S, 1) layout
    return context, attention_weights


def attention_reference(lstm_output, weight, bias):
    scores = jnp.einsum("bsh,oh->bso", lstm_output, weight) + bias   # (B, S, 1)
    w = jax.nn.softmax(scores, axis=1)
    ctx = jnp.sum(w * lstm_output, axis=1)
    return ctx, w


if __name__ == "__main__":
    key = jax.random.PRNGKey(0)
    k_x, k_w, k_b = jax.random.split(key, 3)

    B, S, H = 2, 8, 32  # batch, seq, hidden
    lstm_output = jax.random.normal(k_x, (B, S, H), dtype=jnp.float32)

    # nn.Linear(hidden_size, 1): weight (1, H), bias (1,)
    weight = jax.random.normal(k_w, (1, H), dtype=jnp.float32) * (1.0 / jnp.sqrt(H))
    bias = jax.random.normal(k_b, (1,), dtype=jnp.float32) * 0.01

    ctx, aw = attention_forward(lstm_output, weight, bias)
    jax.block_until_ready((ctx, aw))

    ctx_ref, aw_ref = attention_reference(lstm_output, weight, bias)
    assert ctx.shape == (B, H) and aw.shape == (B, S, 1)
    assert jnp.allclose(ctx, ctx_ref, atol=1e-5, rtol=1e-4)
    assert jnp.allclose(aw, aw_ref, atol=1e-5, rtol=1e-4)

    print("KERNEL_OK")
</pallas_src>

<mosaic_0001>
module attributes {stable_mosaic.version = 11 : i64} {
  func.func @_attention_kernel_fused(%arg0: i32, %arg1: memref<2x8x32xf32, #tpu.memory_space<vmem>>, %arg2: memref<1x32xf32, #tpu.memory_space<vmem>>, %arg3: memref<2x1x32xf32, #tpu.memory_space<vmem>>, %arg4: memref<2x8xf32, #tpu.memory_space<vmem>>) attributes {dimension_semantics = [#tpu.dimension_semantics<parallel>], iteration_bounds = array<i64: 1>, scalar_prefetch = 0 : i64, scratch_operands = 0 : i64, tpu.core_type = #tpu.core_type<tc>, window_params = [{transform_indices = @transform_0, window_bounds = array<i64: 2, 8, 32>}, {pipeline_mode = #tpu.pipeline_mode<synchronous>, transform_indices = @transform_1, window_bounds = array<i64: 1, 32>}, {transform_indices = @transform_2, window_bounds = array<i64: 2, 1, 32>}, {transform_indices = @transform_3, window_bounds = array<i64: 2, 8>}]} {
    %c0 = arith.constant 0 : index
    %c0_0 = arith.constant 0 : index
    %c0_1 = arith.constant 0 : index
    %0 = vector.load %arg1[%c0, %c0_0, %c0_1] : memref<2x8x32xf32, #tpu.memory_space<vmem>>, vector<2x8x32xf32>
    %c0_2 = arith.constant 0 : index
    %c0_3 = arith.constant 0 : index
    %1 = vector.load %arg2[%c0_2, %c0_3] : memref<1x32xf32, #tpu.memory_space<vmem>>, vector<1x32xf32>
    %2 = vector.shape_cast %1 : vector<1x32xf32> to vector<1x1x32xf32>
    %3 = vector.broadcast %2 : vector<1x1x32xf32> to vector<2x8x32xf32>
    %4 = arith.mulf %0, %3 : vector<2x8x32xf32>
    %cst = arith.constant dense<0.000000e+00> : vector<2x8xf32>
    %5 = vector.multi_reduction <add>, %4, %cst [2] : vector<2x8x32xf32> to vector<2x8xf32>
    %cst_4 = arith.constant dense<0xFF800000> : vector<2xf32>
    %6 = vector.multi_reduction <maximumf>, %5, %cst_4 [1] : vector<2x8xf32> to vector<2xf32>
    %7 = vector.shape_cast %6 : vector<2xf32> to vector<2x1xf32>
    %8 = vector.broadcast %7 : vector<2x1xf32> to vector<2x8xf32>
    %9 = arith.subf %5, %8 : vector<2x8xf32>
    %10 = math.exp %9 : vector<2x8xf32>
    %cst_5 = arith.constant dense<0.000000e+00> : vector<2xf32>
    %11 = vector.multi_reduction <add>, %10, %cst_5 [1] : vector<2x8xf32> to vector<2xf32>
    %12 = vector.shape_cast %11 : vector<2xf32> to vector<2x1xf32>
    %13 = tpu.reciprocal %12 {approx = true} : vector<2x1xf32> -> vector<2x1xf32>
    %14 = arith.mulf %12, %13 : vector<2x1xf32>
    %cst_6 = arith.constant 2.000000e+00 : f32
    %15 = vector.broadcast %cst_6 : f32 to vector<2x1xf32>
    %16 = arith.subf %15, %14 : vector<2x1xf32>
    %17 = arith.mulf %13, %16 : vector<2x1xf32>
    %18 = vector.broadcast %17 : vector<2x1xf32> to vector<2x8xf32>
    %19 = arith.mulf %10, %18 : vector<2x8xf32>
    %c0_7 = arith.constant 0 : index
    %c0_8 = arith.constant 0 : index
    %20 = vector.load %arg4[%c0_7, %c0_8] : memref<2x8xf32, #tpu.memory_space<vmem>>, vector<2x8xf32>
    tpu.vector_store %arg4[%c0_7, %c0_8], %19 {strides = array<i32>} : memref<2x8xf32, #tpu.memory_space<vmem>>, vector<2x8xf32>,
    %21 = vector.shape_cast %19 : vector<2x8xf32> to vector<2x8x1xf32>
    %22 = vector.broadcast %21 : vector<2x8x1xf32> to vector<2x8x32xf32>
    %23 = arith.mulf %22, %0 : vector<2x8x32xf32>
    %cst_9 = arith.constant dense<0.000000e+00> : vector<2x32xf32>
    %24 = vector.multi_reduction <add>, %23, %cst_9 [1] : vector<2x8x32xf32> to vector<2x32xf32>
    %25 = vector.shape_cast %24 : vector<2x32xf32> to vector<2x1x32xf32>
    %c0_10 = arith.constant 0 : index
    %c0_11 = arith.constant 0 : index
    %c0_12 = arith.constant 0 : index
    %26 = vector.load %arg3[%c0_10, %c0_11, %c0_12] : memref<2x1x32xf32, #tpu.memory_space<vmem>>, vector<2x1x32xf32>
    tpu.vector_store %arg3[%c0_10, %c0_11, %c0_12], %25 {strides = array<i32>} : memref<2x1x32xf32, #tpu.memory_space<vmem>>, vector<2x1x32xf32>,
    return
  }
  func.func @transform_0(%arg0: i32) -> (i32, i32, i32) {
    %c0_i32 = arith.constant 0 : i32
    %c0_i32_0 = arith.constant 0 : i32
    %c0_i32_1 = arith.constant 0 : i32
    return %arg0, %c0_i32, %c0_i32_0 : i32, i32, i32
  }
  func.func @transform_1(%arg0: i32) -> (i32, i32) {
    %c0_i32 = arith.constant 0 : i32
    %c0_i32_0 = arith.constant 0 : i32
    %c0_i32_1 = arith.constant 0 : i32
    return %c0_i32, %c0_i32_0 : i32, i32
  }
  func.func @transform_2(%arg0: i32) -> (i32, i32, i32) {
    %c0_i32 = arith.constant 0 : i32
    %c0_i32_0 = arith.constant 0 : i32
    %c0_i32_1 = arith.constant 0 : i32
    return %arg0, %c0_i32, %c0_i32_0 : i32, i32, i32
  }
  func.func @transform_3(%arg0: i32) -> (i32, i32) {
    %c0_i32 = arith.constant 0 : i32
    %c0_i32_0 = arith.constant 0 : i32
    return %arg0, %c0_i32 : i32, i32
  }
}

module attributes {stable_mosaic.version = 11 : i64} {
  func.func @_attention_kernel_fallback(%arg0: i32, %arg1: memref<2x8x32xf32, #tpu.memory_space<vmem>>, %arg2: memref<1x32xf32, #tpu.memory_space<vmem>>, %arg3: memref<2x1x32xf32, #tpu.memory_space<vmem>>, %arg4: memref<2x8xf32, #tpu.memory_space<vmem>>) attributes {dimension_semantics = [#tpu.dimension_semantics<parallel>], iteration_bounds = array<i64: 1>, scalar_prefetch = 0 : i64, scratch_operands = 0 : i64, tpu.core_type = #tpu.core_type<tc>, window_params = [{transform_indices = @transform_0, window_bounds = array<i64: 2, 8, 32>}, {pipeline_mode = #tpu.pipeline_mode<synchronous>, transform_indices = @transform_1, window_bounds = array<i64: 1, 32>}, {transform_indices = @transform_2, window_bounds = array<i64: 2, 1, 32>}, {transform_indices = @transform_3, window_bounds = array<i64: 2, 8>}]} {
    %c0 = arith.constant 0 : index
    %c0_0 = arith.constant 0 : index
    %c0_1 = arith.constant 0 : index
    %0 = vector.load %arg1[%c0, %c0_0, %c0_1] : memref<2x8x32xf32, #tpu.memory_space<vmem>>, vector<2x8x32xf32>
    %c0_2 = arith.constant 0 : index
    %c0_3 = arith.constant 0 : index
    %1 = vector.load %arg2[%c0_2, %c0_3] : memref<1x32xf32, #tpu.memory_space<vmem>>, vector<1x32xf32>
    %2 = vector.shape_cast %1 : vector<1x32xf32> to vector<1x1x32xf32>
    %3 = vector.broadcast %2 : vector<1x1x32xf32> to vector<2x8x32xf32>
    %4 = arith.mulf %0, %3 : vector<2x8x32xf32>
    %cst = arith.constant dense<0.000000e+00> : vector<2x8xf32>
    %5 = vector.multi_reduction <add>, %4, %cst [2] : vector<2x8x32xf32> to vector<2x8xf32>
    %6 = vector.shape_cast %5 : vector<2x8xf32> to vector<2x8x1xf32>
    %cst_4 = arith.constant dense<0xFF800000> : vector<2x1xf32>
    %7 = vector.multi_reduction <maximumf>, %6, %cst_4 [1] : vector<2x8x1xf32> to vector<2x1xf32>
    %8 = vector.shape_cast %7 : vector<2x1xf32> to vector<2x1x1xf32>
    %9 = vector.broadcast %8 : vector<2x1x1xf32> to vector<2x8x1xf32>
    %10 = arith.subf %6, %9 : vector<2x8x1xf32>
    %11 = math.exp %10 : vector<2x8x1xf32>
    %cst_5 = arith.constant dense<0.000000e+00> : vector<2x1xf32>
    %12 = vector.multi_reduction <add>, %11, %cst_5 [1] : vector<2x8x1xf32> to vector<2x1xf32>
    %13 = vector.shape_cast %12 : vector<2x1xf32> to vector<2x1x1xf32>
    %14 = tpu.reciprocal %13 {approx = true} : vector<2x1x1xf32> -> vector<2x1x1xf32>
    %15 = arith.mulf %13, %14 : vector<2x1x1xf32>
    %cst_6 = arith.constant 2.000000e+00 : f32
    %16 = vector.broadcast %cst_6 : f32 to vector<2x1x1xf32>
    %17 = arith.subf %16, %15 : vector<2x1x1xf32>
    %18 = arith.mulf %14, %17 : vector<2x1x1xf32>
    %19 = vector.broadcast %18 : vector<2x1x1xf32> to vector<2x8x1xf32>
    %20 = arith.mulf %11, %19 : vector<2x8x1xf32>
    %21 = vector.broadcast %20 : vector<2x8x1xf32> to vector<2x8x32xf32>
    %22 = arith.mulf %21, %0 : vector<2x8x32xf32>
    %cst_7 = arith.constant dense<0.000000e+00> : vector<2x32xf32>
    %23 = vector.multi_reduction <add>, %22, %cst_7 [1] : vector<2x8x32xf32> to vector<2x32xf32>
    %24 = vector.shape_cast %23 : vector<2x32xf32> to vector<2x1x32xf32>
    %c0_8 = arith.constant 0 : index
    %c0_9 = arith.constant 0 : index
    %c0_10 = arith.constant 0 : index
    %25 = vector.load %arg3[%c0_8, %c0_9, %c0_10] : memref<2x1x32xf32, #tpu.memory_space<vmem>>, vector<2x1x32xf32>
    tpu.vector_store %arg3[%c0_8, %c0_9, %c0_10], %24 {strides = array<i32>} : memref<2x1x32xf32, #tpu.memory_space<vmem>>, vector<2x1x32xf32>,
    %cst_11 = arith.constant dense<0.000000e+00> : vector<2x8xf32>
    %26 = vector.multi_reduction <add>, %4, %cst_11 [2] : vector<2x8x32xf32> to vector<2x8xf32>
    %cst_12 = arith.constant dense<0xFF800000> : vector<2xf32>
    %27 = vector.multi_reduction <maximumf>, %26, %cst_12 [1] : vector<2x8xf32> to vector<2xf32>
    %28 = vector.shape_cast %27 : vector<2xf32> to vector<2x1xf32>
    %29 = vector.broadcast %28 : vector<2x1xf32> to vector<2x8xf32>
    %30 = arith.subf %26, %29 : vector<2x8xf32>
    %31 = math.exp %30 : vector<2x8xf32>
    %cst_13 = arith.constant dense<0.000000e+00> : vector<2xf32>
    %32 = vector.multi_reduction <add>, %31, %cst_13 [1] : vector<2x8xf32> to vector<2xf32>
    %33 = vector.shape_cast %32 : vector<2xf32> to vector<2x1xf32>
    %34 = tpu.reciprocal %33 {approx = true} : vector<2x1xf32> -> vector<2x1xf32>
    %35 = arith.mulf %33, %34 : vector<2x1xf32>
    %cst_14 = arith.constant 2.000000e+00 : f32
    %36 = vector.broadcast %cst_14 : f32 to vector<2x1xf32>
    %37 = arith.subf %36, %35 : vector<2x1xf32>
    %38 = arith.mulf %34, %37 : vector<2x1xf32>
    %39 = vector.broadcast %38 : vector<2x1xf32> to vector<2x8xf32>
    %40 = arith.mulf %31, %39 : vector<2x8xf32>
    %c0_15 = arith.constant 0 : index
    %c0_16 = arith.constant 0 : index
    %41 = vector.load %arg4[%c0_15, %c0_16] : memref<2x8xf32, #tpu.memory_space<vmem>>, vector<2x8xf32>
    tpu.vector_store %arg4[%c0_15, %c0_16], %40 {strides = array<i32>} : memref<2x8xf32, #tpu.memory_space<vmem>>, vector<2x8xf32>,
    return
  }
  func.func @transform_0(%arg0: i32) -> (i32, i32, i32) {
    %c0_i32 = arith.constant 0 : i32
    %c0_i32_0 = arith.constant 0 : i32
    %c0_i32_1 = arith.constant 0 : i32
    return %arg0, %c0_i32, %c0_i32_0 : i32, i32, i32
  }
  func.func @transform_1(%arg0: i32) -> (i32, i32) {
    %c0_i32 = arith.constant 0 : i32
    %c0_i32_0 = arith.constant 0 : i32
    %c0_i32_1 = arith.constant 0 : i32
    return %c0_i32, %c0_i32_0 : i32, i32
  }
  func.func @transform_2(%arg0: i32) -> (i32, i32, i32) {
    %c0_i32 = arith.constant 0 : i32
    %c0_i32_0 = arith.constant 0 : i32
    %c0_i32_1 = arith.constant 0 : i32
    return %arg0, %c0_i32, %c0_i32_0 : i32, i32, i32
  }
  func.func @transform_3(%arg0: i32) -> (i32, i32) {
    %c0_i32 = arith.constant 0 : i32
    %c0_i32_0 = arith.constant 0 : i32
    return %arg0, %c0_i32 : i32, i32
  }
}

</mosaic_0001>

<bundles_post_ra>
// kernel: tpu_custom_call.1
= control target key start
LH: loop header
LB: loop body
LE: loop exit
PB: predicated region body
PF: predicated region fallthrough
CT: control target
= control target key end

     0   :  { %9 = vsyncpa [#allocation3], 0  ;;  %s362_s0 = inlined_call_operand.hbm [shape: f32[2,8,32], index: 0, kind: input, shape index: {}]   ;;  %s363_s1 = inlined_call_operand.vmem [shape: f32[1,32], index: 1, kind: input, shape index: {}]   ;;  %s364_s2 = inlined_call_operand.hbm [shape: f32[2,1,32], index: 2, kind: output, shape index: {0}]   ;;  %s365_s3 = inlined_call_operand.hbm [shape: f32[2,8], index: 3, kind: output, shape index: {1}]  }
   0x1   :  { %10 = vsyncpa [#allocation4], 0 }
   0x2   :  { %11 = vsyncpa [#allocation7], 0  ;;  %s281_s12 = smov [#allocation2]   ;;  %s209_s16 = scalar_lea.hbm %s362_s0, 256 }
   0x3   :  { %s17_s13 = sshll.u32 %s281_s12, 4  ;;  %p210_p0 = scmp.ne.s32.totalorder %s362_s0, %s209_s16  ;;  %s18_s13 = int_to_ptr.vmem [resolvable:$true] %s17_s13 }
   0x4   :  { %p213_p1 = scmp.lt.u32.totalorder %s209_s16, %s362_s0 }
   0x6   :  { %p215_p2 = pnand %p213_p1, %p210_p0 }
   0x8   :  { %218 = shalt.err (!%p215_p2)
}
   0x9   :  { %s219_s21 = scalar_lea.vmem %s18_s13, 256  ;;  %p224_p4 = scmp.lt.s32.totalorder %s18_s13, %s18_s13 }
   0xa   :  { %p220_p3 = scmp.ne.s32.totalorder %s18_s13, %s219_s21  ;;  %p225_p5 = scmp.lt.s32.totalorder %s219_s21, %s219_s21 }
   0xc   :  { %p226_p6 = por %p225_p5, %p224_p4 }
   0xe   :  { %p227_p7 = pnand %p226_p6, %p220_p3 }
  0x10   :  { %230 = shalt.err (!%p227_p7)
}
  0x11   :  { %s282_s22 = smov 128   ;;  %s283_s23 = smov 8  }
  0x12   :  { %23 = dma.hbm_to_vmem [thread:$0]  %s362_s0, 256, %s18_s13, [#allocation3], %s282_s22, %s282_s22, %s283_s23  }
  0x13   :  { %275 = dma.done.wait [#allocation3], 256  }
  0x14   :  { %276 = vsyncadd [#allocation3], 4294967040  ;;  %v29_v0 = vld [vmem:[#allocation2] sm:$0xff]  ;;  %vm40_vm0 = vcmask 261120   ;;  %v324_v2 = vld [vmem:[#allocation2 + $0x8] sm:$0xff]  ;;  %v49_v7 = vlaneseq  ;;  %vm59_vm1 = vcmask 1041409  }
  0x15   :  { %v192_v1 = vld [vmem:[%s363_s1] ss:$0 sm:$0xff]  ;;  %vm62_vm2 = vcmask 58368   ;;  %v284_v17 = vmov 0   ;;  %s285_s0 = smov [#allocation6]  }
  0x16   :  { %v38_v3 = vmul.f32 %v192_v1, %v29_v0  ;;  %v39_v4 = vmul.f32 %v192_v1, %v324_v2  ;;  %v50_v8 = vand.u32 127, %v49_v7  ;;  %v52_v9 = vshrl.u32 %v49_v7, 7  ;;  %202 = vset.pattern.permute.xlu0 %v284_v17  ;;  %201 = vset.pattern.permute.xlu1 %v284_v17  ;;  %s179_s1 = sshll.u32 %s285_s0, 4  ;;  %s180_s1 = int_to_ptr.vmem [resolvable:$true] %s179_s1 }
  0x17   :  { %s231_s28 = scalar_lea.vmem %s180_s1, 32  ;;  %p236_p9 = scmp.lt.s32.totalorder %s180_s1, %s180_s1 }
  0x18   :  { %v41_v5 = vsel %vm40_vm0, %v38_v3, 0.0  ;;  %v44_v6 = vsel %vm40_vm0, %v39_v4, 0.0  ;;  %v53_v11 = vsub.s32 %v50_v8, %v52_v9  ;;  %v69_v18 = vsub.s32 0, %v52_v9  ;;  %p232_p8 = scmp.ne.s32.totalorder %s180_s1, %s231_s28  ;;  %p237_p10 = scmp.lt.s32.totalorder %s231_s28, %s231_s28 }
  0x19   :  { %42 = vadd.xlane.f32.xlu0 %v41_v5  ;;  %v73_v19 = vsub.s32 1, %v52_v9 }
  0x1a   :  { %p238_p11 = por %p237_p10, %p236_p9 }
  0x1c   :  { %p239_p12 = pnand %p238_p11, %p232_p8 }
  0x1d   :  { %45 = vadd.xlane.f32.xlu0 %v44_v6 }
  0xa6   :  { %v43_v10 = vpop.xlane.xlu0 %42 }
  0xa7   :  { %v54_v13 = vrot.slane %v43_v10, %v53_v11 }
  0xaa   :  { %v46_v12 = vpop.xlane.xlu0 %45 }
  0xab   :  { %v58_v14 = vrot.slane %v46_v12, %v53_v11 }
  0xad   :  { %v60_v15 = vsel %vm59_vm1, %v58_v14, %v54_v13 }
  0xae   :  { %v63_v16 = vsel %vm62_vm2, %v60_v15, -inf }
  0xaf   :  { %64 = vmax.xlane.f32.xlu1 %v63_v16 }
 0x13c   :  { %v65_v20 = vpop.xlane.xlu1 %64 }
 0x13d   :  { %v70_v21 = vrot.slane %v65_v20, %v69_v18  ;;  %v74_v22 = vrot.slane %v65_v20, %v73_v19 }
 0x13f   :  { %v77_v23 = vsub.f32 %v43_v10, %v70_v21  ;;  %v78_v24 = vsub.f32 %v46_v12, %v74_v22 }
 0x141   :  { %v79_v25 = vmul.f32 1.442695, %v77_v23  ;;  %v81_v26 = vmul.f32 1.442695, %v78_v24 }
 0x143   :  { %203 = vpow2.f32 %v79_v25 }
 0x144   :  { %205 = vpow2.f32 %v81_v26 }
 0x14d   :  { %v204_v27 = vpop.eup %203 }
 0x14e   :  { %v206_v28 = vpop.eup %205  ;;  %86 = vperm.xlu1 %201, %v204_v27  }
 0x14f   :  { %89 = vperm.xlu0 %202, %v206_v28  }
 0x1cd   :  { %v87_v29 = vpop.permute.xlu1 %86 }
 0x1ce   :  { %v90_v30 = vpop.permute.xlu0 %89  ;;  %v94_v31 = vrot.slane %v87_v29, %v53_v11 }
 0x1cf   :  { %v98_v32 = vrot.slane %v90_v30, %v53_v11 }
 0x1d1   :  { %v99_v33 = vsel %vm59_vm1, %v98_v32, %v94_v31 }
 0x1d2   :  { %v101_v34 = vsel %vm62_vm2, %v99_v33, 0.0 }
 0x1d3   :  { %102 = vadd.xlane.f32.xlu1 %v101_v34 }
 0x260   :  { %v103_v35 = vpop.xlane.xlu1 %102 }
 0x261   :  { %207 = vrcp.f32 %v103_v35 }
 0x26b   :  { %v208_v36 = vpop.eup %207 }
 0x26c   :  { %v105_v37 = vmul.f32 %v208_v36, %v103_v35 }
 0x26e   :  { %v106_v38 = vsub.f32 2.0, %v105_v37 }
 0x270   :  { %v107_v39 = vmul.f32 %v208_v36, %v106_v38 }
 0x272   :  { %v112_v40 = vrot.slane %v107_v39, %v69_v18  ;;  %v116_v41 = vrot.slane %v107_v39, %v73_v19 }
 0x274   :  { %v119_v42 = vmul.f32 %v204_v27, %v112_v40  ;;  %v120_v43 = vmul.f32 %v206_v28, %v116_v41 }
 0x276   :  { %124 = vperm.xlu0 %202, %v119_v42  }
 0x27a   :  { %127 = vperm.xlu0 %202, %v120_v43  }
 0x2f5   :  { %v125_v44 = vpop.permute.xlu0 %124 }
 0x2f6   :  { %v142_v45 = vmul.f32 %v125_v44, %v29_v0  ;;  %v132_v49 = vrot.slane %v125_v44, %v53_v11 }
 0x2f8   :  { %v144_v46 = vsel %vm40_vm0, %v142_v45, 0.0 }
 0x2f9   :  { %v145_v47 = vrot.slane %v144_v46, 4  ;;  %v128_v48 = vpop.permute.xlu0 %127 }
 0x2fa   :  { %v136_v50 = vrot.slane %v128_v48, %v53_v11  ;;  %v143_v51 = vmul.f32 %v128_v48, %v324_v2 }
 0x2fb   :  { %v146_v52 = vadd.f32 %v145_v47, %v144_v46 }
 0x2fc   :  { %v151_v53 = vsel %vm40_vm0, %v143_v51, 0.0  ;;  %v137_v54 = vsel %vm59_vm1, %v136_v50, %v132_v49 }
 0x2fd   :  { %v147_v55 = vrot.slane %v146_v52, 2  ;;  %v152_v56 = vrot.slane %v151_v53, 4  ;;  %139 = vst.msk [vmem:[#allocation6] sm:$0x3] %vm62_vm2, %v137_v54 }
 0x2fe   :  { %242 = shalt.err (!%p239_p12)
}
 0x2ff   :  { %s243_s4 = scalar_lea.hbm %s365_s3, 32 }
 0x300   :  { %p244_p13 = scmp.ne.s32.totalorder %s365_s3, %s243_s4  ;;  %p247_p0 = scmp.lt.u32.totalorder %s243_s4, %s365_s3 }
 0x302   :  { %p249_p1 = pnand %p247_p0, %p244_p13 }
 0x304   :  { %252 = shalt.err (!%p249_p1)
}
 0x305   :  { %182 = dma.vmem_to_hbm [thread:$0]  %s180_s1, 32, %s365_s3, [#allocation7]   ;;  %v148_v57 = vadd.f32 %v147_v55, %v146_v52  ;;  %v153_v58 = vadd.f32 %v152_v56, %v151_v53  ;;  %vm158_vm3 = vcmask 253952  }
 0x306   :  { %s286_s11 = smov [#allocation5]  }
 0x307   :  { %v149_v59 = vrot.slane %v148_v57, 1  ;;  %v154_v60 = vrot.slane %v153_v58, 2  ;;  %s166_s12 = sshll.u32 %s286_s11, 4  ;;  %s167_s12 = int_to_ptr.vmem [resolvable:$true] %s166_s12 }
 0x308   :  { %s253_s13 = scalar_lea.vmem %s167_s12, 32  ;;  %p258_p3 = scmp.lt.s32.totalorder %s167_s12, %s167_s12 }
 0x309   :  { %v150_v61 = vadd.f32 %v149_v59, %v148_v57  ;;  %v155_v62 = vadd.f32 %v154_v60, %v153_v58  ;;  %p254_p2 = scmp.ne.s32.totalorder %s167_s12, %s253_s13  ;;  %p259_p4 = scmp.lt.s32.totalorder %s253_s13, %s253_s13 }
 0x30b   :  { %v156_v63 = vrot.slane %v155_v62, 1  ;;  %159 = vst.msk [vmem:[#allocation5] sm:$0x1] %vm158_vm3, %v150_v61  ;;  %p260_p5 = por %p259_p4, %p258_p3 }
 0x30d   :  { %v157_v0 = vadd.f32 %v156_v63, %v155_v62  ;;  %p261_p6 = pnand %p260_p5, %p254_p2 }
 0x30f   :  { %160 = vst.msk [vmem:[#allocation5 + $0x1] sm:$0x1] %vm158_vm3, %v157_v0 }
 0x310   :  { %264 = shalt.err (!%p261_p6)
}
 0x311   :  { %s265_s15 = scalar_lea.hbm %s364_s2, 32 }
 0x312   :  { %p266_p7 = scmp.ne.s32.totalorder %s364_s2, %s265_s15  ;;  %p269_p8 = scmp.lt.u32.totalorder %s265_s15, %s364_s2 }
 0x314   :  { %p271_p9 = pnand %p269_p8, %p266_p7 }
 0x316   :  { %274 = shalt.err (!%p271_p9)
}
 0x317   :  { %s287_s20 = smov 16   ;;  %s288_s21 = smov 1  }
 0x318   :  { %172 = dma.vmem_to_hbm [thread:$0]  %s167_s12, 32, %s364_s2, [#allocation4], %s287_s20, %s287_s20, %s288_s21  }
 0x319   :  { %277 = dma.done.wait [#allocation4], 32  }
 0x31a   :  { %278 = vsyncadd [#allocation4], 4294967264 }
 0x31b   :  { %279 = dma.done.wait [#allocation7], 32  }
 0x31c   :  { %280 = vsyncadd [#allocation7], 4294967264 }
 0x31d   :  { %189 = vsyncpa [#allocation3], 1 }
 0x31e   :  { %190 = vsyncpa [#allocation4], 1 }
 0x31f   :  { %191 = vsyncpa [#allocation7], 1 }

// kernel: tpu_custom_call.1
= control target key start
LH: loop header
LB: loop body
LE: loop exit
PB: predicated region body
PF: predicated region fallthrough
CT: control target
= control target key end

     0   :  { %9 = vsyncpa [#allocation3], 0  ;;  %s439_s0 = inlined_call_operand.hbm [shape: f32[2,8,32], index: 0, kind: input, shape index: {}]   ;;  %s440_s1 = inlined_call_operand.vmem [shape: f32[1,32], index: 1, kind: input, shape index: {}]   ;;  %s441_s2 = inlined_call_operand.hbm [shape: f32[2,1,32], index: 2, kind: output, shape index: {0}]   ;;  %s442_s3 = inlined_call_operand.hbm [shape: f32[2,8], index: 3, kind: output, shape index: {1}]  }
   0x1   :  { %10 = vsyncpa [#allocation4], 0 }
   0x2   :  { %11 = vsyncpa [#allocation7], 0  ;;  %s327_s12 = smov [#allocation2]   ;;  %s255_s16 = scalar_lea.hbm %s439_s0, 256 }
   0x3   :  { %s17_s13 = sshll.u32 %s327_s12, 4  ;;  %p256_p0 = scmp.ne.s32.totalorder %s439_s0, %s255_s16  ;;  %s18_s13 = int_to_ptr.vmem [resolvable:$true] %s17_s13 }
   0x4   :  { %p259_p1 = scmp.lt.u32.totalorder %s255_s16, %s439_s0 }
   0x6   :  { %p261_p2 = pnand %p259_p1, %p256_p0 }
   0x8   :  { %264 = shalt.err (!%p261_p2)
}
   0x9   :  { %s265_s21 = scalar_lea.vmem %s18_s13, 256  ;;  %p270_p4 = scmp.lt.s32.totalorder %s18_s13, %s18_s13 }
   0xa   :  { %p266_p3 = scmp.ne.s32.totalorder %s18_s13, %s265_s21  ;;  %p271_p5 = scmp.lt.s32.totalorder %s265_s21, %s265_s21 }
   0xc   :  { %p272_p6 = por %p271_p5, %p270_p4 }
   0xe   :  { %p273_p7 = pnand %p272_p6, %p266_p3 }
  0x10   :  { %276 = shalt.err (!%p273_p7)
}
  0x11   :  { %s328_s22 = smov 128   ;;  %s329_s23 = smov 8  }
  0x12   :  { %23 = dma.hbm_to_vmem [thread:$0]  %s439_s0, 256, %s18_s13, [#allocation3], %s328_s22, %s328_s22, %s329_s23  }
  0x13   :  { %321 = dma.done.wait [#allocation3], 256  }
  0x14   :  { %322 = vsyncadd [#allocation3], 4294967040  ;;  %v367_v0 = vld [vmem:[#allocation2] sm:$0xff]  ;;  %vm40_vm0 = vcmask 261120   ;;  %v372_v2 = vld [vmem:[#allocation2 + $0x8] sm:$0xff]  ;;  %v108_v7 = vlaneseq  ;;  %vm118_vm1 = vcmask 1041409  }
  0x15   :  { %v230_v1 = vld [vmem:[%s440_s1] ss:$0 sm:$0xff]  ;;  %vm121_vm2 = vcmask 58368   ;;  %v330_v37 = vmov 0   ;;  %vm103_vm3 = vcmask 253952   ;;  %s331_s0 = smov [#allocation5]  }
  0x16   :  { %v38_v3 = vmul.f32 %v230_v1, %v367_v0  ;;  %v39_v4 = vmul.f32 %v230_v1, %v372_v2  ;;  %v109_v8 = vand.u32 127, %v108_v7  ;;  %v378_v9 = vshrl.u32 %v108_v7, 7  ;;  %240 = vset.pattern.permute.xlu0 %v330_v37  ;;  %239 = vset.pattern.permute.xlu1 %v330_v37  ;;  %s204_s1 = sshll.u32 %s331_s0, 4  ;;  %s205_s1 = int_to_ptr.vmem [resolvable:$true] %s204_s1 }
  0x17   :  { %s277_s28 = scalar_lea.vmem %s205_s1, 32  ;;  %p282_p9 = scmp.lt.s32.totalorder %s205_s1, %s205_s1 }
  0x18   :  { %v41_v5 = vsel %vm40_vm0, %v38_v3, 0.0  ;;  %v44_v6 = vsel %vm40_vm0, %v39_v4, 0.0  ;;  %v384_v12 = vsub.s32 %v109_v8, %v378_v9  ;;  %p278_p8 = scmp.ne.s32.totalorder %s205_s1, %s277_s28  ;;  %p283_p10 = scmp.lt.s32.totalorder %s277_s28, %s277_s28 }
  0x19   :  { %42 = vadd.xlane.f32.xlu0 %v41_v5 }
  0x1a   :  { %p284_p11 = por %p283_p10, %p282_p9 }
  0x1c   :  { %p285_p12 = pnand %p284_p11, %p278_p8 }
  0x1d   :  { %45 = vadd.xlane.f32.xlu0 %v44_v6 }
  0xa6   :  { %v380_v10 = vpop.xlane.xlu0 %42 }
  0xa7   :  { %v47_v11 = vrot.slane %v380_v10, 4  ;;  %v113_v17 = vrot.slane %v380_v10, %v384_v12 }
  0xa9   :  { %v48_v13 = vmax.f32 %v380_v10, %v47_v11 }
  0xaa   :  { %v387_v14 = vpop.xlane.xlu0 %45 }
  0xab   :  { %v49_v15 = vrot.slane %v48_v13, 2  ;;  %v53_v16 = vrot.slane %v387_v14, 4  ;;  %v117_v18 = vrot.slane %v387_v14, %v384_v12 }
  0xad   :  { %v50_v19 = vmax.f32 %v48_v13, %v49_v15  ;;  %v54_v20 = vmax.f32 %v387_v14, %v53_v16  ;;  %v119_v21 = vsel %vm118_vm1, %v117_v18, %v113_v17  ;;  %v128_v15 = vsub.s32 0, %v378_v9 }
  0xae   :  { %v122_v22 = vsel %vm121_vm2, %v119_v21, -inf }
  0xaf   :  { %v51_v23 = vrot.slane %v50_v19, 1  ;;  %v55_v24 = vrot.slane %v54_v20, 2  ;;  %123 = vmax.xlane.f32.xlu1 %v122_v22 }
  0xb1   :  { %v52_v25 = vmax.f32 %v50_v19, %v51_v23  ;;  %v56_v26 = vmax.f32 %v54_v20, %v55_v24 }
  0xb3   :  { %v59_v27 = vsub.f32 %v380_v10, %v52_v25  ;;  %v57_v28 = vrot.slane %v56_v26, 1 }
  0xb5   :  { %v61_v29 = vmul.f32 1.442695, %v59_v27  ;;  %v58_v30 = vmax.f32 %v56_v26, %v57_v28 }
  0xb7   :  { %241 = vpow2.f32 %v61_v29  ;;  %v60_v31 = vsub.f32 %v387_v14, %v58_v30 }
  0xb9   :  { %v63_v32 = vmul.f32 1.442695, %v60_v31 }
  0xbb   :  { %243 = vpow2.f32 %v63_v32 }
  0xc1   :  { %v242_v33 = vpop.eup %241 }
  0xc2   :  { %v65_v34 = vrot.slane %v242_v33, 4 }
  0xc4   :  { %v66_v35 = vadd.f32 %v242_v33, %v65_v34 }
  0xc5   :  { %v244_v36 = vpop.eup %243 }
  0xc6   :  { %v71_v38 = vrot.slane %v244_v36, 4  ;;  %v67_v39 = vrot.slane %v66_v35, 2 }
  0xc8   :  { %v68_v40 = vadd.f32 %v67_v39, %v66_v35  ;;  %v72_v41 = vadd.f32 %v244_v36, %v71_v38 }
  0xca   :  { %v69_v42 = vrot.slane %v68_v40, 1  ;;  %v73_v43 = vrot.slane %v72_v41, 2 }
  0xcc   :  { %v70_v44 = vadd.f32 %v69_v42, %v68_v40  ;;  %v74_v45 = vadd.f32 %v73_v43, %v72_v41 }
  0xce   :  { %v75_v46 = vrot.slane %v74_v45, 1  ;;  %245 = vrcp.f32 %v70_v44 }
  0xd0   :  { %v76_v47 = vadd.f32 %v75_v46, %v74_v45 }
  0xd2   :  { %247 = vrcp.f32 %v76_v47 }
  0xd8   :  { %v246_v48 = vpop.eup %245 }
  0xd9   :  { %v79_v49 = vmul.f32 %v246_v48, %v70_v44 }
  0xdb   :  { %v81_v50 = vsub.f32 2.0, %v79_v49 }
  0xdc   :  { %v248_v51 = vpop.eup %247 }
  0xdd   :  { %v80_v52 = vmul.f32 %v248_v51, %v76_v47  ;;  %v83_v53 = vmul.f32 %v246_v48, %v81_v50 }
  0xdf   :  { %v82_v54 = vsub.f32 2.0, %v80_v52  ;;  %v85_v55 = vmul.f32 %v242_v33, %v83_v53 }
  0xe1   :  { %v84_v56 = vmul.f32 %v248_v51, %v82_v54  ;;  %v87_v57 = vmul.f32 %v85_v55, %v367_v0 }
  0xe3   :  { %v86_v58 = vmul.f32 %v244_v36, %v84_v56  ;;  %v89_v59 = vsel %vm40_vm0, %v87_v57, 0.0 }
  0xe4   :  { %v90_v60 = vrot.slane %v89_v59, 4 }
  0xe5   :  { %v88_v61 = vmul.f32 %v86_v58, %v372_v2  ;;  %v132_v2 = vsub.s32 1, %v378_v9 }
  0xe6   :  { %v91_v62 = vadd.f32 %v90_v60, %v89_v59 }
  0xe7   :  { %v96_v63 = vsel %vm40_vm0, %v88_v61, 0.0 }
  0xe8   :  { %v92_v1 = vrot.slane %v91_v62, 2  ;;  %v97_v3 = vrot.slane %v96_v63, 4 }
  0xea   :  { %v93_v4 = vadd.f32 %v92_v1, %v91_v62  ;;  %v98_v5 = vadd.f32 %v97_v3, %v96_v63 }
  0xec   :  { %v94_v6 = vrot.slane %v93_v4, 1  ;;  %v99_v7 = vrot.slane %v98_v5, 2 }
  0xee   :  { %v95_v8 = vadd.f32 %v94_v6, %v93_v4  ;;  %v100_v11 = vadd.f32 %v99_v7, %v98_v5 }
  0xf0   :  { %v101_v13 = vrot.slane %v100_v11, 1  ;;  %104 = vst.msk [vmem:[#allocation5] sm:$0x1] %vm103_vm3, %v95_v8 }
  0xf2   :  { %v102_v0 = vadd.f32 %v101_v13, %v100_v11 }
  0xf4   :  { %105 = vst.msk [vmem:[#allocation5 + $0x1] sm:$0x1] %vm103_vm3, %v102_v0 }
 0x13c   :  { %v124_v16 = vpop.xlane.xlu1 %123 }
 0x13d   :  { %v129_v17 = vrot.slane %v124_v16, %v128_v15  ;;  %v133_v18 = vrot.slane %v124_v16, %v132_v2 }
 0x13f   :  { %v136_v19 = vsub.f32 %v380_v10, %v129_v17  ;;  %v137_v20 = vsub.f32 %v387_v14, %v133_v18 }
 0x141   :  { %v138_v21 = vmul.f32 1.442695, %v136_v19  ;;  %v140_v22 = vmul.f32 1.442695, %v137_v20 }
 0x143   :  { %249 = vpow2.f32 %v138_v21 }
 0x144   :  { %251 = vpow2.f32 %v140_v22 }
 0x14d   :  { %v250_v23 = vpop.eup %249 }
 0x14e   :  { %v252_v24 = vpop.eup %251  ;;  %145 = vperm.xlu1 %239, %v250_v23  }
 0x14f   :  { %148 = vperm.xlu0 %240, %v252_v24  }
 0x1cd   :  { %v146_v25 = vpop.permute.xlu1 %145 }
 0x1ce   :  { %v149_v26 = vpop.permute.xlu0 %148  ;;  %v153_v27 = vrot.slane %v146_v25, %v384_v12 }
 0x1cf   :  { %v157_v9 = vrot.slane %v149_v26, %v384_v12 }
 0x1d1   :  { %v158_v28 = vsel %vm118_vm1, %v157_v9, %v153_v27 }
 0x1d2   :  { %v160_v10 = vsel %vm121_vm2, %v158_v28, 0.0 }
 0x1d3   :  { %161 = vadd.xlane.f32.xlu1 %v160_v10 }
 0x260   :  { %v162_v14 = vpop.xlane.xlu1 %161 }
 0x261   :  { %253 = vrcp.f32 %v162_v14 }
 0x26b   :  { %v254_v29 = vpop.eup %253 }
 0x26c   :  { %v164_v30 = vmul.f32 %v254_v29, %v162_v14 }
 0x26e   :  { %v165_v31 = vsub.f32 2.0, %v164_v30 }
 0x270   :  { %v166_v32 = vmul.f32 %v254_v29, %v165_v31 }
 0x272   :  { %v171_v33 = vrot.slane %v166_v32, %v128_v15  ;;  %v175_v34 = vrot.slane %v166_v32, %v132_v2 }
 0x274   :  { %v178_v35 = vmul.f32 %v250_v23, %v171_v33  ;;  %v179_v36 = vmul.f32 %v252_v24, %v175_v34 }
 0x276   :  { %183 = vperm.xlu0 %240, %v178_v35  }
 0x27a   :  { %186 = vperm.xlu0 %240, %v179_v36  }
 0x27b   :  { %288 = shalt.err (!%p285_p12)
}
 0x27c   :  { %s289_s4 = scalar_lea.hbm %s441_s2, 32 }
 0x27d   :  { %p290_p13 = scmp.ne.s32.totalorder %s441_s2, %s289_s4  ;;  %p293_p0 = scmp.lt.u32.totalorder %s289_s4, %s441_s2 }
 0x27f   :  { %p295_p1 = pnand %p293_p0, %p290_p13 }
 0x281   :  { %298 = shalt.err (!%p295_p1)
}
 0x282   :  { %s332_s9 = smov 16   ;;  %s333_s10 = smov 1  }
 0x283   :  { %210 = dma.vmem_to_hbm [thread:$0]  %s205_s1, 32, %s441_s2, [#allocation4], %s332_s9, %s332_s9, %s333_s10  }
 0x284   :  { %s334_s13 = smov [#allocation6]  }
 0x285   :  { %s217_s14 = sshll.u32 %s334_s13, 4  ;;  %s218_s14 = int_to_ptr.vmem [resolvable:$true] %s217_s14 }
 0x286   :  { %s299_s15 = scalar_lea.vmem %s218_s14, 32  ;;  %p304_p3 = scmp.lt.s32.totalorder %s218_s14, %s218_s14 }
 0x287   :  { %p300_p2 = scmp.ne.s32.totalorder %s218_s14, %s299_s15  ;;  %p305_p4 = scmp.lt.s32.totalorder %s299_s15, %s299_s15 }
 0x289   :  { %p306_p5 = por %p305_p4, %p304_p3 }
 0x28b   :  { %p307_p6 = pnand %p306_p5, %p300_p2 }
 0x2f5   :  { %v184_v37 = vpop.permute.xlu0 %183 }
 0x2f6   :  { %v191_v39 = vrot.slane %v184_v37, %v384_v12 }
 0x2f9   :  { %v187_v38 = vpop.permute.xlu0 %186 }
 0x2fa   :  { %v195_v40 = vrot.slane %v187_v38, %v384_v12 }
 0x2fc   :  { %v196_v41 = vsel %vm118_vm1, %v195_v40, %v191_v39 }
 0x2fd   :  { %198 = vst.msk [vmem:[#allocation6] sm:$0x3] %vm121_vm2, %v196_v41 }
 0x2fe   :  { %310 = shalt.err (!%p307_p6)
}
 0x2ff   :  { %s311_s17 = scalar_lea.hbm %s442_s3, 32 }
 0x300   :  { %p312_p7 = scmp.ne.s32.totalorder %s442_s3, %s311_s17  ;;  %p315_p8 = scmp.lt.u32.totalorder %s311_s17, %s442_s3 }
 0x302   :  { %p317_p9 = pnand %p315_p8, %p312_p7 }
 0x304   :  { %320 = shalt.err (!%p317_p9)
}
 0x305   :  { %220 = dma.vmem_to_hbm [thread:$0]  %s218_s14, 32, %s442_s3, [#allocation7]  }
 0x306   :  { %323 = dma.done.wait [#allocation4], 32  }
 0x307   :  { %324 = vsyncadd [#allocation4], 4294967264 }
 0x308   :  { %325 = dma.done.wait [#allocation7], 32  }
 0x309   :  { %326 = vsyncadd [#allocation7], 4294967264 }
 0x30a   :  { %227 = vsyncpa [#allocation3], 1 }
 0x30b   :  { %228 = vsyncpa [#allocation4], 1 }
 0x30c   :  { %229 = vsyncpa [#allocation7], 1 }

</bundles_post_ra>
